<compile_context>
chip_gen: v5e
topology: v5e:2x2
jax: 0.10.0
libtpu: 0.0.40
codegen_flags: <defaults>
</compile_context>

<pallas_src>
import functools

import jax
import jax.numpy as jnp
import numpy as np
from jax.experimental import pallas as pl
from jax.experimental.pallas import tpu as pltpu


def _convblock_kernel(p_ref, w_ref, b_ref, g_ref, beta_ref, o_ref):
    # p_ref:    (K, S)     im2col patches; K = Cin*KH*KW (sublanes), S = N*H*W (lanes)
    # w_ref:    (Cout, K)  conv weights, contraction-ready
    # b_ref:    (Cout, 1)  conv bias
    # g_ref:    (Cout, 1)  batch-norm gamma
    # beta_ref: (Cout, 1)  batch-norm beta
    # o_ref:    (Cout, S)  lane-dense output slab
    acc = jnp.dot(w_ref[...].astype(jnp.float32),
                  p_ref[...].astype(jnp.float32),
                  preferred_element_type=jnp.float32)          # (Cout, S)
    acc = acc + b_ref[...].astype(jnp.float32)                 # broadcast along lanes

    # BatchNorm2d, training mode: per-channel (per-row) batch statistics over the
    # S = N*H*W lane axis, biased variance, eps = 1e-5, affine gamma/beta.
    # Two-pass form kept for numerical stability (the reduces sit on the XLU slot
    # and are essentially free with this layout).
    mean = jnp.mean(acc, axis=1, keepdims=True)                # (Cout, 1)
    var = jnp.mean((acc - mean) ** 2, axis=1, keepdims=True)   # (Cout, 1)
    h = (acc - mean) * jax.lax.rsqrt(var + 1e-5)
    h = h * g_ref[...].astype(jnp.float32) + beta_ref[...].astype(jnp.float32)

    # nonlinearity(act='swish'): x * sigmoid(x).  Dropout(p=0.0) is identity.
    h = h * jax.nn.sigmoid(h)

    o_ref[...] = h.astype(o_ref.dtype)


@jax.jit
def convblock_forward(x_nchw, w_oihw, bias, gamma, beta):
    """PyTorch-compatible front end: NCHW in, NCHW out."""
    N, Cin, H, W = x_nchw.shape
    Cout, _, KH, KW = w_oihw.shape
    K = Cin * KH * KW
    S = N * H * W

    # Single pre-kernel gather: pad=1 + im2col straight from NCHW.
    # patches[(c, kh, kw), (n, h, w)] = x_pad[n, c, h+kh, w+kw]
    x_pad = jnp.pad(x_nchw, ((0, 0), (0, 0), (1, 1), (1, 1)))
    taps = [x_pad[:, :, kh:kh + H, kw:kw + W]                  # each (N, Cin, H, W)
            for kh in range(KH) for kw in range(KW)]
    patches = (jnp.stack(taps, axis=0)                          # (KH*KW, N, Cin, H, W)
               .transpose(2, 0, 1, 3, 4)                        # (Cin, KH*KW, N, H, W)
               .reshape(K, S))

    # (Cout, Cin, KH, KW) -> (Cout, K) matches the (Cin, KH, KW) contraction order.
    w_mat = w_oihw.reshape(Cout, K)
    b2 = bias.reshape(Cout, 1)
    g2 = gamma.reshape(Cout, 1)
    be2 = beta.reshape(Cout, 1)

    out_slab = pl.pallas_call(
        _convblock_kernel,
        out_shape=jax.ShapeDtypeStruct((Cout, S), x_nchw.dtype),
        grid=(1,),
        in_specs=[
            pl.BlockSpec((K, S), lambda i: (0, 0)),
            pl.BlockSpec((Cout, K), lambda i: (0, 0)),
            pl.BlockSpec((Cout, 1), lambda i: (0, 0)),
            pl.BlockSpec((Cout, 1), lambda i: (0, 0)),
            pl.BlockSpec((Cout, 1), lambda i: (0, 0)),
        ],
        out_specs=pl.BlockSpec((Cout, S), lambda i: (0, 0)),
        compiler_params=pltpu.CompilerParams(
            dimension_semantics=("arbitrary",)),
    )(patches, w_mat, b2, g2, be2)

    # Single post-kernel reshape/transpose back to NCHW.
    return out_slab.reshape(Cout, N, H, W).transpose(1, 0, 2, 3)


def _reference(x_nchw, w_oihw, bias, gamma, beta):
    """Pure-JAX reference mirroring the PyTorch forward."""
    y = jax.lax.conv_general_dilated(
        x_nchw.astype(jnp.float32), w_oihw.astype(jnp.float32),
        window_strides=(1, 1), padding=((1, 1), (1, 1)),
        dimension_numbers=("NCHW", "OIHW", "NCHW"))
    y = y + bias.reshape(1, -1, 1, 1)
    mean = jnp.mean(y, axis=(0, 2, 3), keepdims=True)
    var = jnp.mean((y - mean) ** 2, axis=(0, 2, 3), keepdims=True)
    y = (y - mean) / jnp.sqrt(var + 1e-5)
    y = y * gamma.reshape(1, -1, 1, 1) + beta.reshape(1, -1, 1, 1)
    return y * jax.nn.sigmoid(y)


if __name__ == "__main__":
    # Convblock(in_channels=4, out_channels=8, dim='2D', kernel=3, act='swish', dropout=0.0)
    N, Cin, H, W = 2, 4, 16, 16
    Cout, Kk = 8, 3

    key = jax.random.PRNGKey(0)
    kx, kw, kb = jax.random.split(key, 3)

    x = jax.random.normal(kx, (N, Cin, H, W), dtype=jnp.float32)
    fan_in = Cin * Kk * Kk
    w = jax.random.uniform(kw, (Cout, Cin, Kk, Kk), jnp.float32,
                           minval=-1.0, maxval=1.0) / np.sqrt(fan_in)
    b = jax.random.uniform(kb, (Cout,), jnp.float32,
                           minval=-1.0, maxval=1.0) / np.sqrt(fan_in)
    gamma = jnp.ones((Cout,), jnp.float32)
    beta = jnp.zeros((Cout,), jnp.float32)

    out = convblock_forward(x, w, b, gamma, beta)
    out = jax.block_until_ready(out)

    ref = _reference(x, w, b, gamma, beta)
    np.testing.assert_allclose(np.asarray(out), np.asarray(ref), rtol=1e-4, atol=1e-4)

    print("KERNEL_OK")
</pallas_src>

<mosaic_0001>
module attributes {stable_mosaic.version = 11 : i64} {
  func.func @_convblock_kernel(%arg0: i32, %arg1: memref<36x512xf32, #tpu.memory_space<vmem>>, %arg2: memref<8x36xf32, #tpu.memory_space<vmem>>, %arg3: memref<8x1xf32, #tpu.memory_space<vmem>>, %arg4: memref<8x1xf32, #tpu.memory_space<vmem>>, %arg5: memref<8x1xf32, #tpu.memory_space<vmem>>, %arg6: memref<8x512xf32, #tpu.memory_space<vmem>>) attributes {dimension_semantics = [#tpu.dimension_semantics<arbitrary>], iteration_bounds = array<i64: 1>, scalar_prefetch = 0 : i64, scratch_operands = 0 : i64, tpu.core_type = #tpu.core_type<tc>, window_params = [{pipeline_mode = #tpu.pipeline_mode<synchronous>, transform_indices = @transform_0, window_bounds = array<i64: 36, 512>}, {pipeline_mode = #tpu.pipeline_mode<synchronous>, transform_indices = @transform_1, window_bounds = array<i64: 8, 36>}, {pipeline_mode = #tpu.pipeline_mode<synchronous>, transform_indices = @transform_2, window_bounds = array<i64: 8, 1>}, {pipeline_mode = #tpu.pipeline_mode<synchronous>, transform_indices = @transform_3, window_bounds = array<i64: 8, 1>}, {pipeline_mode = #tpu.pipeline_mode<synchronous>, transform_indices = @transform_4, window_bounds = array<i64: 8, 1>}, {pipeline_mode = #tpu.pipeline_mode<synchronous>, transform_indices = @transform_5, window_bounds = array<i64: 8, 512>}]} {
    %c0 = arith.constant 0 : index
    %c0_0 = arith.constant 0 : index
    %0 = vector.load %arg2[%c0, %c0_0] : memref<8x36xf32, #tpu.memory_space<vmem>>, vector<8x36xf32>
    %c0_1 = arith.constant 0 : index
    %c0_2 = arith.constant 0 : index
    %1 = vector.load %arg1[%c0_1, %c0_2] : memref<36x512xf32, #tpu.memory_space<vmem>>, vector<36x512xf32>
    %cst = arith.constant dense<0.000000e+00> : vector<8x512xf32>
    %2 = tpu.matmul %0, %1, %cst {dimension_numbers = #tpu.dot_dimension_numbers<[1], [0], [0], [1], [0, 0, 1, 1], [], []>} : vector<8x36xf32>, vector<36x512xf32>, vector<8x512xf32> -> vector<8x512xf32>
    %c0_3 = arith.constant 0 : index
    %c0_4 = arith.constant 0 : index
    %3 = vector.load %arg3[%c0_3, %c0_4] : memref<8x1xf32, #tpu.memory_space<vmem>>, vector<8x1xf32>
    %4 = vector.broadcast %3 : vector<8x1xf32> to vector<8x512xf32>
    %5 = arith.addf %2, %4 : vector<8x512xf32>
    %cst_5 = arith.constant dense<0.000000e+00> : vector<8xf32>
    %6 = vector.multi_reduction <add>, %5, %cst_5 [1] : vector<8x512xf32> to vector<8xf32>
    %7 = vector.shape_cast %6 : vector<8xf32> to vector<8x1xf32>
    %cst_6 = arith.constant 5.120000e+02 : f32
    %8 = vector.broadcast %cst_6 : f32 to vector<8x1xf32>
    %9 = arith.divf %7, %8 : vector<8x1xf32>
    %10 = vector.broadcast %9 : vector<8x1xf32> to vector<8x512xf32>
    %11 = arith.subf %5, %10 : vector<8x512xf32>
    %12 = arith.mulf %11, %11 : vector<8x512xf32>
    %cst_7 = arith.constant dense<0.000000e+00> : vector<8xf32>
    %13 = vector.multi_reduction <add>, %12, %cst_7 [1] : vector<8x512xf32> to vector<8xf32>
    %14 = vector.shape_cast %13 : vector<8xf32> to vector<8x1xf32>
    %cst_8 = arith.constant 5.120000e+02 : f32
    %15 = vector.broadcast %cst_8 : f32 to vector<8x1xf32>
    %16 = arith.divf %14, %15 : vector<8x1xf32>
    %17 = vector.broadcast %9 : vector<8x1xf32> to vector<8x512xf32>
    %18 = arith.subf %5, %17 : vector<8x512xf32>
    %cst_9 = arith.constant 9.99999974E-6 : f32
    %19 = vector.broadcast %cst_9 : f32 to vector<8x1xf32>
    %20 = arith.addf %16, %19 : vector<8x1xf32>
    %21 = math.rsqrt %20 : vector<8x1xf32>
    %22 = vector.broadcast %21 : vector<8x1xf32> to vector<8x512xf32>
    %23 = arith.mulf %18, %22 : vector<8x512xf32>
    %c0_10 = arith.constant 0 : index
    %c0_11 = arith.constant 0 : index
    %24 = vector.load %arg4[%c0_10, %c0_11] : memref<8x1xf32, #tpu.memory_space<vmem>>, vector<8x1xf32>
    %25 = vector.broadcast %24 : vector<8x1xf32> to vector<8x512xf32>
    %26 = arith.mulf %23, %25 : vector<8x512xf32>
    %c0_12 = arith.constant 0 : index
    %c0_13 = arith.constant 0 : index
    %27 = vector.load %arg5[%c0_12, %c0_13] : memref<8x1xf32, #tpu.memory_space<vmem>>, vector<8x1xf32>
    %28 = vector.broadcast %27 : vector<8x1xf32> to vector<8x512xf32>
    %29 = arith.addf %26, %28 : vector<8x512xf32>
    %30 = arith.negf %29 : vector<8x512xf32>
    %31 = math.exp %30 : vector<8x512xf32>
    %cst_14 = arith.constant 1.000000e+00 : f32
    %32 = vector.broadcast %cst_14 : f32 to vector<8x512xf32>
    %33 = arith.addf %32, %31 : vector<8x512xf32>
    %34 = arith.divf %32, %33 : vector<8x512xf32>
    %35 = arith.mulf %29, %34 : vector<8x512xf32>
    %c0_15 = arith.constant 0 : index
    %c0_16 = arith.constant 0 : index
    %36 = vector.load %arg6[%c0_15, %c0_16] : memref<8x512xf32, #tpu.memory_space<vmem>>, vector<8x512xf32>
    tpu.vector_store %arg6[%c0_15, %c0_16], %35 {strides = array<i32>} : memref<8x512xf32, #tpu.memory_space<vmem>>, vector<8x512xf32>,
    return
  }
  func.func @transform_0(%arg0: i32) -> (i32, i32) {
    %c0_i32 = arith.constant 0 : i32
    %c0_i32_0 = arith.constant 0 : i32
    %c0_i32_1 = arith.constant 0 : i32
    return %c0_i32, %c0_i32_0 : i32, i32
  }
  func.func @transform_1(%arg0: i32) -> (i32, i32) {
    %c0_i32 = arith.constant 0 : i32
    %c0_i32_0 = arith.constant 0 : i32
    %c0_i32_1 = arith.constant 0 : i32
    return %c0_i32, %c0_i32_0 : i32, i32
  }
  func.func @transform_2(%arg0: i32) -> (i32, i32) {
    %c0_i32 = arith.constant 0 : i32
    %c0_i32_0 = arith.constant 0 : i32
    %c0_i32_1 = arith.constant 0 : i32
    return %c0_i32, %c0_i32_0 : i32, i32
  }
  func.func @transform_3(%arg0: i32) -> (i32, i32) {
    %c0_i32 = arith.constant 0 : i32
    %c0_i32_0 = arith.constant 0 : i32
    %c0_i32_1 = arith.constant 0 : i32
    return %c0_i32, %c0_i32_0 : i32, i32
  }
  func.func @transform_4(%arg0: i32) -> (i32, i32) {
    %c0_i32 = arith.constant 0 : i32
    %c0_i32_0 = arith.constant 0 : i32
    %c0_i32_1 = arith.constant 0 : i32
    return %c0_i32, %c0_i32_0 : i32, i32
  }
  func.func @transform_5(%arg0: i32) -> (i32, i32) {
    %c0_i32 = arith.constant 0 : i32
    %c0_i32_0 = arith.constant 0 : i32
    %c0_i32_1 = arith.constant 0 : i32
    return %c0_i32, %c0_i32_0 : i32, i32
  }
}

</mosaic_0001>

<bundles_post_ra>
// kernel: convblock_forward.1
= control target key start
LH: loop header
LB: loop body
LE: loop exit
PB: predicated region body
PF: predicated region fallthrough
CT: control target
= control target key end

     0   :  { %vm51_vm0 = vcmask 1043456   ;;  %v331_v3 = vmov 0   ;;  %vm47_vm1 = vcmask 293888   ;;  %v332_v35 = vmov 512.0   ;;  %s480_s0 = inlined_call_operand.vmem [shape: f32[36,512], index: 0, kind: input, shape index: {}]   ;;  %s481_s1 = inlined_call_operand.vmem [shape: f32[8,36], index: 1, kind: input, shape index: {}]   ;;  %s482_s2 = inlined_call_operand.vmem [shape: f32[8,1], index: 2, kind: input, shape index: {}]   ;;  %s483_s4 = inlined_call_operand.vmem [shape: f32[8,1], index: 4, kind: input, shape index: {}]   ;;  %s484_s3 = inlined_call_operand.vmem [shape: f32[8,1], index: 3, kind: input, shape index: {}]   ;;  %s485_s5 = inlined_call_operand.vmem [shape: f32[8,512], index: 5, kind: output, shape index: {}]  }
   0x1   :  { %v39_v0 = vld [vmem:[%s480_s0 + $0x90] sm:$0xf]  ;;  %v40_v1 = vld [vmem:[%s480_s0 + $0x98] sm:$0xf]  ;;  %308 = vset.pattern.permute.xlu0 %v331_v3  ;;  %309 = vset.pattern.permute.xlu1 %v331_v3  ;;  %v37_v5 = vld [vmem:[%s480_s0 + $0x80] sm:$0xf]  ;;  %311 = vrcp.f32 %v332_v35 }
   0x2   :  { %v35_v2 = vld [vmem:[%s480_s0 + $0x70] sm:$0xff]  ;;  %298 = vmatpush.msk.msra.mxu2 %vm51_vm0, %v39_v0  ;;  %300 = vmatpush.msk.msra.mxu3 %vm51_vm0, %v40_v1  ;;  %v36_v4 = vld [vmem:[%s480_s0 + $0x78] sm:$0xff]  ;;  %v38_v6 = vld [vmem:[%s480_s0 + $0x88] sm:$0xf] }
   0x3   :  { %294 = vmatpush.msk.msra.mxu0 %vm51_vm0, %v37_v5  ;;  %296 = vmatpush.msk.msra.mxu1 %vm51_vm0, %v38_v6  ;;  %v31_v7 = vld [vmem:[%s480_s0 + $0x50] sm:$0xff]  ;;  %v32_v8 = vld [vmem:[%s480_s0 + $0x58] sm:$0xff]  ;;  %v33_v9 = vld [vmem:[%s480_s0 + $0x60] sm:$0xff] }
   0x4   :  { %116 = vmatpush.msra.mxu2 %v35_v2  ;;  %136 = vmatpush.msra.mxu3 %v36_v4  ;;  %v34_v10 = vld [vmem:[%s480_s0 + $0x68] sm:$0xff]  ;;  %v27_v11 = vld [vmem:[%s480_s0 + $0x30] sm:$0xff]  ;;  %v28_v12 = vld [vmem:[%s480_s0 + $0x38] sm:$0xff] }
   0x5   :  { %76 = vmatpush.msra.mxu0 %v33_v9  ;;  %96 = vmatpush.msra.mxu1 %v34_v10  ;;  %v29_v13 = vld [vmem:[%s480_s0 + $0x40] sm:$0xff]  ;;  %v30_v14 = vld [vmem:[%s480_s0 + $0x48] sm:$0xff]  ;;  %v23_v16 = vld [vmem:[%s480_s0 + $0x10] sm:$0xff] }
   0x6   :  { %117 = vmatpush.msra.mxu2 %v31_v7  ;;  %137 = vmatpush.msra.mxu3 %v32_v8  ;;  %v25_v15 = vld [vmem:[%s480_s0 + $0x20] sm:$0xff]  ;;  %v24_v17 = vld [vmem:[%s480_s0 + $0x18] sm:$0xff]  ;;  %v26_v18 = vld [vmem:[%s480_s0 + $0x28] sm:$0xff] }
   0x7   :  { %77 = vmatpush.msra.mxu0 %v29_v13  ;;  %97 = vmatpush.msra.mxu1 %v30_v14  ;;  %v20_v19 = vld [vmem:[%s481_s1] sm:$0xff]  ;;  %v22_v21 = vld [vmem:[%s480_s0 + $0x8] sm:$0xff]  ;;  %v312_v36 = vpop.eup %311 }
   0x8   :  { %118 = vmatpush.msra.mxu2 %v27_v11  ;;  %138 = vmatpush.msra.mxu3 %v28_v12  ;;  %v21_v20 = vld [vmem:[%s480_s0] sm:$0xff]  ;;  %v150_v37 = vmul.f32 512.0, %v312_v36  ;;  %vm154_vm2 = vweird.f32 %v312_v36 }
   0x9   :  { %78 = vmatpush.msra.mxu0 %v25_v15  ;;  %98 = vmatpush.msra.mxu1 %v26_v18  ;;  %v41_v22 = vld [vmem:[%s482_s2] sm:$0xff] }
   0xa   :  { %119 = vmatpush.msra.mxu2 %v23_v16  ;;  %139 = vmatpush.msra.mxu3 %v24_v17  ;;  %v151_v38 = vsub.f32 1.0, %v150_v37  ;;  %v196_v50 = vld [vmem:[%s483_s4] sm:$0xff] }
   0xb   :  { %299 = vmatmul.msk.f32.vlgmr.msra.gmra.mxu2 %vm47_vm1, %v20_v19  ;;  %301 = vmatmul.msk.f32.vlgmr.msra.gmra.mxu3 %vm47_vm1, %v20_v19  ;;  %v186_v56 = vld [vmem:[%s484_s3] sm:$0xff] }
   0xc   :  { %79 = vmatpush.msra.mxu0 %v21_v20  ;;  %99 = vmatpush.msra.mxu1 %v22_v21  ;;  %v152_v39 = vmul.f32 %v312_v36, %v151_v38 }
   0xd   :  { %295 = vmatmul.msk.f32.vlgmr.msra.gmra.mxu0 %vm47_vm1, %v20_v19  ;;  %297 = vmatmul.msk.f32.vlgmr.msra.gmra.mxu1 %vm47_vm1, %v20_v19 }
   0xe   :  { %44 = vperm.xlu0 %308, %v41_v22   ;;  %310 = vset.pattern.permute.xlu2 %v331_v3  ;;  %v153_v40 = vadd.f32 %v312_v36, %v152_v39 }
   0xf   :  { %199 = vperm.xlu2 %310, %v196_v50  }
  0x10   :  { %v155_v41 = vsel %vm154_vm2, %v312_v36, %v153_v40 }
  0x69   :  { %v200_v8 = vpop.permute.xlu2 %199 }
  0x80   :  { %v45_v23 = vpop.permute.xlu0 %44 }
  0x8a   :  { %v81_v24 = vpop.f32.mrf.mxu0  ;;  %v101_v25 = vpop.f32.mrf.mxu1 }
  0x8b   :  { %v82_v26 = vadd.f32 %v81_v24, %v45_v23  ;;  %v102_v27 = vadd.f32 %v101_v25, %v45_v23 }
  0x8d   :  { %v144_v28 = vadd.f32 %v102_v27, %v82_v26 }
  0x8e   :  { %v121_v29 = vpop.f32.mrf.mxu2  ;;  %v141_v30 = vpop.f32.mrf.mxu3 }
  0x8f   :  { %v122_v31 = vadd.f32 %v121_v29, %v45_v23  ;;  %v142_v33 = vadd.f32 %v141_v30, %v45_v23 }
  0x91   :  { %v145_v32 = vadd.f32 %v144_v28, %v122_v31 }
  0x93   :  { %v146_v34 = vadd.f32 %v145_v32, %v142_v33 }
  0x95   :  { %147 = vadd.xlane.f32.xlu0 %v146_v34 }
 0x108   :  { %v148_v42 = vpop.xlane.xlu0 %147 }
 0x109   :  { %v156_v43 = vmul.f32 %v155_v41, %v148_v42 }
 0x10b   :  { %v157_v44 = vsub.f32 %v82_v26, %v156_v43  ;;  %v158_v45 = vsub.f32 %v102_v27, %v156_v43  ;;  %v159_v46 = vsub.f32 %v122_v31, %v156_v43  ;;  %v160_v47 = vsub.f32 %v142_v33, %v156_v43 }
 0x10d   :  { %v161_v48 = vmul.f32 %v157_v44, %v157_v44  ;;  %v162_v49 = vmul.f32 %v158_v45, %v158_v45  ;;  %v163_v51 = vmul.f32 %v159_v46, %v159_v46  ;;  %v164_v53 = vmul.f32 %v160_v47, %v160_v47 }
 0x10f   :  { %v165_v52 = vadd.f32 %v162_v49, %v161_v48 }
 0x111   :  { %v166_v54 = vadd.f32 %v165_v52, %v163_v51 }
 0x113   :  { %v167_v55 = vadd.f32 %v166_v54, %v164_v53 }
 0x115   :  { %168 = vadd.xlane.f32.xlu1 %v167_v55 }
 0x12e   :  { %189 = vperm.xlu1 %309, %v186_v56  }
 0x188   :  { %v169_v57 = vpop.xlane.xlu1 %168 }
 0x189   :  { %v170_v58 = vmul.f32 %v169_v57, %v155_v41 }
 0x18b   :  { %v171_v59 = vadd.f32 1e-05, %v170_v58 }
 0x18d   :  { %313 = vrsqrt.f32 %v171_v59  ;;  %vm178_vm4 = vweird.f32 %v171_v59 }
 0x193   :  { %v314_v60 = vpop.eup %313 }
 0x194   :  { %v173_v61 = vmul.f32 %v314_v60, %v171_v59  ;;  %vm179_vm3 = vweird.f32 %v314_v60 }
 0x195   :  { %vm180_vm5 = vmor %vm178_vm4, %vm179_vm3 }
 0x196   :  { %v174_v62 = vmul.f32 %v314_v60, %v173_v61 }
 0x198   :  { %v175_v63 = vmul.f32 0.5, %v174_v62 }
 0x19a   :  { %v176_v0 = vsub.f32 1.5, %v175_v63 }
 0x19c   :  { %v177_v1 = vmul.f32 %v314_v60, %v176_v0 }
 0x19e   :  { %v181_v2 = vsel %vm180_vm5, %v314_v60, %v177_v1 }
 0x19f   :  { %v182_v3 = vmul.f32 %v181_v2, %v157_v44  ;;  %v183_v4 = vmul.f32 %v181_v2, %v158_v45  ;;  %v184_v5 = vmul.f32 %v181_v2, %v159_v46  ;;  %v185_v6 = vmul.f32 %v181_v2, %v160_v47 }
 0x1a0   :  { %v190_v7 = vpop.permute.xlu1 %189 }
 0x1a1   :  { %v192_v9 = vmul.f32 %v190_v7, %v182_v3  ;;  %v193_v10 = vmul.f32 %v190_v7, %v183_v4  ;;  %v194_v11 = vmul.f32 %v190_v7, %v184_v5  ;;  %v195_v12 = vmul.f32 %v190_v7, %v185_v6 }
 0x1a3   :  { %v435_v13 = vadd.f32 %v200_v8, %v192_v9  ;;  %v437_v14 = vadd.f32 %v200_v8, %v193_v10  ;;  %v439_v15 = vadd.f32 %v200_v8, %v194_v11  ;;  %v441_v16 = vadd.f32 %v200_v8, %v195_v12 }
 0x1a5   :  { %v302_v17 = vmul.f32 -1.442695, %v435_v13  ;;  %v303_v18 = vmul.f32 -1.442695, %v437_v14  ;;  %v304_v19 = vmul.f32 -1.442695, %v439_v15 }
 0x1a6   :  { %v305_v20 = vmul.f32 -1.442695, %v441_v16 }
 0x1a7   :  { %315 = vpow2.f32 %v302_v17 }
 0x1a8   :  { %317 = vpow2.f32 %v303_v18 }
 0x1a9   :  { %319 = vpow2.f32 %v304_v19 }
 0x1aa   :  { %321 = vpow2.f32 %v305_v20 }
 0x1ad   :  { %v316_v21 = vpop.eup %315 }
 0x1ae   :  { %v318_v22 = vpop.eup %317  ;;  %v218_v23 = vadd.f32 1.0, %v316_v21 }
 0x1af   :  { %v320_v24 = vpop.eup %319  ;;  %v219_v25 = vadd.f32 1.0, %v318_v22 }
 0x1b0   :  { %v322_v26 = vpop.eup %321  ;;  %v220_v27 = vadd.f32 1.0, %v320_v24  ;;  %323 = vrcp.f32 %v218_v23  ;;  %v231_v29 = vand.u32 2147483647, %v218_v23  ;;  %v233_v30 = vand.u32 2147483648, %v218_v23 }
 0x1b1   :  { %v221_v28 = vadd.f32 1.0, %v322_v26  ;;  %325 = vrcp.f32 %v219_v25  ;;  %vm227_vm6 = vweird.f32 %v218_v23  ;;  %vm242_vm7 = vweird.f32 %v219_v25 }
 0x1b2   :  { %327 = vrcp.f32 %v220_v27  ;;  %v246_v36 = vand.u32 2147483647, %v219_v25  ;;  %v248_v37 = vand.u32 2147483648, %v219_v25  ;;  %vm447_vm8 = vcmp.eq.f32.partialorder %v231_v29, 8.507059e+37 }
 0x1b3   :  { %329 = vrcp.f32 %v221_v28  ;;  %v234_v40 = vor.u32 1.1754944e-38, %v233_v30  ;;  %vm257_vm9 = vweird.f32 %v220_v27  ;;  %v261_v44 = vand.u32 2147483647, %v220_v27 }
 0x1b4   :  { %v263_v45 = vand.u32 2147483648, %v220_v27  ;;  %vm451_vm12 = vcmp.eq.f32.partialorder %v246_v36, 8.507059e+37  ;;  %v249_v51 = vor.u32 1.1754944e-38, %v248_v37  ;;  %vm272_vm15 = vweird.f32 %v221_v28 }
 0x1b5   :  { %v276_v56 = vand.u32 2147483647, %v221_v28  ;;  %v278_v57 = vand.u32 2147483648, %v221_v28  ;;  %vm262_vm3 = vcmp.eq.f32.partialorder %v261_v44, 8.507059e+37 }
 0x1b6   :  { %v324_v31 = vpop.eup %323  ;;  %v264_v63 = vor.u32 1.1754944e-38, %v263_v45 }
 0x1b7   :  { %v326_v32 = vpop.eup %325  ;;  %v223_v33 = vmul.f32 %v324_v31, %v218_v23  ;;  %vm228_vm10 = vweird.f32 %v324_v31  ;;  %v279_v5 = vor.u32 1.1754944e-38, %v278_v57  ;;  %vm277_vm5 = vcmp.eq.f32.partialorder %v276_v56, 8.507059e+37 }
 0x1b8   :  { %v328_v34 = vpop.eup %327  ;;  %v238_v35 = vmul.f32 %v326_v32, %v219_v25  ;;  %vm243_vm11 = vweird.f32 %v326_v32  ;;  %vm229_vm14 = vmor %vm227_vm6, %vm228_vm10 }
 0x1b9   :  { %v224_v38 = vsub.f32 1.0, %v223_v33  ;;  %v253_v41 = vmul.f32 %v328_v34, %v220_v27  ;;  %v330_v42 = vpop.eup %329  ;;  %vm258_vm13 = vweird.f32 %v328_v34  ;;  %vm244_vm0 = vmor %vm242_vm7, %vm243_vm11 }
 0x1ba   :  { %v239_v43 = vsub.f32 1.0, %v238_v35  ;;  %v268_v48 = vmul.f32 %v330_v42, %v221_v28  ;;  %vm273_vm1 = vweird.f32 %v330_v42  ;;  %vm259_vm2 = vmor %vm257_vm9, %vm258_vm13 }
 0x1bb   :  { %v225_v46 = vmul.f32 %v324_v31, %v224_v38  ;;  %v254_v47 = vsub.f32 1.0, %v253_v41  ;;  %vm274_vm4 = vmor %vm272_vm15, %vm273_vm1 }
 0x1bc   :  { %v240_v49 = vmul.f32 %v326_v32, %v239_v43  ;;  %v269_v54 = vsub.f32 1.0, %v268_v48 }
 0x1bd   :  { %v226_v52 = vadd.f32 %v324_v31, %v225_v46  ;;  %v255_v53 = vmul.f32 %v328_v34, %v254_v47 }
 0x1be   :  { %v241_v55 = vadd.f32 %v326_v32, %v240_v49  ;;  %v270_v60 = vmul.f32 %v330_v42, %v269_v54 }
 0x1bf   :  { %v230_v58 = vsel %vm229_vm14, %v324_v31, %v226_v52  ;;  %v256_v59 = vadd.f32 %v328_v34, %v255_v53 }
 0x1c0   :  { %v235_v61 = vsel %vm447_vm8, %v234_v40, %v230_v58  ;;  %v245_v62 = vsel %vm244_vm0, %v326_v32, %v241_v55  ;;  %v271_v2 = vadd.f32 %v330_v42, %v270_v60 }
 0x1c1   :  { %v250_v0 = vsel %vm451_vm12, %v249_v51, %v245_v62  ;;  %v260_v1 = vsel %vm259_vm2, %v328_v34, %v256_v59  ;;  %v282_v3 = vmul.f32 %v235_v61, %v435_v13 }
 0x1c2   :  { %v265_v4 = vsel %vm262_vm3, %v264_v63, %v260_v1  ;;  %v283_v6 = vmul.f32 %v250_v0, %v437_v14  ;;  %v275_v7 = vsel %vm274_vm4, %v330_v42, %v271_v2 }
 0x1c3   :  { %v284_v8 = vmul.f32 %v265_v4, %v439_v15  ;;  %286 = vst [vmem:[%s485_s5] sm:$0xff] %v282_v3  ;;  %v280_v9 = vsel %vm277_vm5, %v279_v5, %v275_v7 }
 0x1c4   :  { %287 = vst [vmem:[%s485_s5 + $0x8] sm:$0xff] %v283_v6  ;;  %v285_v10 = vmul.f32 %v280_v9, %v441_v16 }
 0x1c5   :  { %288 = vst [vmem:[%s485_s5 + $0x10] sm:$0xff] %v284_v8 }
 0x1c6   :  { %289 = vst [vmem:[%s485_s5 + $0x18] sm:$0xff] %v285_v10 }

</bundles_post_ra>
